<compile_context>
chip_gen: v7x
topology: tpu7x:2x2x1
jax: 0.10.0
libtpu: 0.0.40
codegen_flags: <defaults>
</compile_context>

<pallas_src>
import jax
import jax.numpy as jnp
from jax.experimental import pallas as pl
from jax.experimental.pallas import tpu as pltpu

_LANES = 128
_SUBLANES = 8
# Worst-case sublane alignment among f32 (8), bf16 (16), int8 (32) blocks.
_ROW_ALIGN = 32


def _round_up(x, m):
    return ((x + m - 1) // m) * m


def _tensorcores_per_chip():
    """2 on dual-TensorCore chips (v7x), 1 on v5e/v6e or if undetectable."""
    try:
        kind = jax.devices()[0].device_kind.lower()
    except Exception:
        return 1
    return 2 if ("v7" in kind or "tpu7" in kind) else 1


def _smooth_l1_kernel(pred_ref, gt_ref, mask_ref, out_ref, acc_ref):
    """Per-lane partial sums of SmoothL1(beta=1) on masked rgb.

    Grid is (num_parts, k_steps): axis 0 'parallel' (megacore), axis 1 the
    sequential reduction axis.  acc_ref is a per-core (8, 128) f32 accumulator.
    """
    k = pl.program_id(1)

    @pl.when(k == 0)
    def _():
        acc_ref[...] = jnp.zeros_like(acc_ref)

    # Load in native dtype, upcast on the VPU (free; kernel is HBM-bound).
    p = pred_ref[...].astype(jnp.float32)
    g = gt_ref[...].astype(jnp.float32)
    m = mask_ref[...].astype(jnp.float32)

    # Fused masking: |p*m - g*m| == |(p - g)*m| (distributivity; only a
    # rounding-level difference from PyTorch's op order).
    d = jnp.abs((p - g) * m)
    elem = jnp.where(d < 1.0, 0.5 * d * d, d - 0.5)
    # Rows with m == 0 contribute exactly 0.  The mask stream covers the full
    # grid and is zero-padded past the true data, so this select also zeroes
    # garbage rows of boundary blocks (select does not propagate NaN/Inf from
    # the unselected operand).
    elem = jnp.where(m != 0.0, elem, 0.0)

    # Fold sublane groups of 8 rows into the small resident accumulator
    # (pure VPU adds; the reshape stays within (8,128) vreg tiles).
    tr = elem.shape[0]
    acc_ref[...] += elem.reshape(tr // _SUBLANES, _SUBLANES, _LANES).sum(axis=0)

    @pl.when(k == pl.num_programs(1) - 1)
    def _():
        out_ref[...] = acc_ref[...]


def criterion_loss(pred_rgb, gt_rgb, mask, *, target_tile_rows=None, num_parts=None):
    """pred_rgb, gt_rgb: (N, C) float (f32 or bf16); mask: (N,) any dtype."""
    n, c = pred_rgb.shape
    total = n * c  # denominator of the mean (true element count)

    cores = _tensorcores_per_chip()
    if num_parts is None:
        num_parts = cores
    if target_tile_rows is None:
        target_tile_rows = 8192 if cores > 1 else 4096

    rows = pl.cdiv(total, _LANES)
    if rows < 256:
        num_parts = 1  # tiny inputs: no benefit from a megacore split

    # Tile rows: multiple of 32 (int8/bf16/f32 sublane packing), as large as
    # the target, never forcing a pad of pred/gt just to fit the block.
    tile_rows = min(target_tile_rows, _round_up(pl.cdiv(rows, num_parts), _ROW_ALIGN))
    if tile_rows > rows:
        tile_rows = max(_ROW_ALIGN, _ROW_ALIGN * (rows // _ROW_ALIGN))
    k_steps = pl.cdiv(rows, num_parts * tile_rows)
    grid_rows = num_parts * k_steps * tile_rows

    # --- pred / gt streams: native dtype, zero-copy reshape when possible ---
    pred_flat = pred_rgb.reshape(-1)
    gt_flat = gt_rgb.reshape(-1)
    arr_rows = max(rows, tile_rows)
    pad_elems = arr_rows * _LANES - total
    if pad_elems:
        # TODO(synk): when N*3 is not a multiple of 128 this is still one
        # full-stream pad copy; a fully copy-free ragged tail would need a 1-D
        # lane layout for pred/gt.
        pred_flat = jnp.pad(pred_flat, (0, pad_elems))
        gt_flat = jnp.pad(gt_flat, (0, pad_elems))
    pred2 = pred_flat.reshape(arr_rows, _LANES)
    gt2 = gt_flat.reshape(arr_rows, _LANES)

    # --- mask stream: int8 for bool masks, f32 otherwise (exact .float()) ---
    if mask.dtype == jnp.bool_:
        mask_cast = mask.astype(jnp.int8)
    else:
        mask_cast = mask.astype(jnp.float32)
    mask_flat = jnp.broadcast_to(mask_cast[:, None], (n, c)).reshape(-1)
    mask_pad = grid_rows * _LANES - total
    if mask_pad:
        # Fuses with the broadcast into a single write; the zero padding is the
        # in-kernel validity mask for rows past the true data.
        mask_flat = jnp.pad(mask_flat, (0, mask_pad))
    mask2 = mask_flat.reshape(grid_rows, _LANES)

    # pred/gt block index is clamped so a block origin never lands fully past
    # the array end (the mask zeroes any repeated/garbage rows anyway).
    pg_last_block = (arr_rows - 1) // tile_rows

    def pg_map(p, k):
        return (jnp.minimum(p * k_steps + k, pg_last_block), 0)

    def mask_map(p, k):
        return (p * k_steps + k, 0)

    out_rows = num_parts * _SUBLANES
    in_bytes = (pred2.size * pred2.dtype.itemsize
                + gt2.size * gt2.dtype.itemsize
                + mask2.size * mask2.dtype.itemsize)
    cost = pl.CostEstimate(
        flops=9 * total,
        transcendentals=0,
        bytes_accessed=in_bytes + out_rows * _LANES * 4,
    )

    partials = pl.pallas_call(
        _smooth_l1_kernel,
        out_shape=jax.ShapeDtypeStruct((out_rows, _LANES), jnp.float32),
        grid_spec=pltpu.PrefetchScalarGridSpec(
            num_scalar_prefetch=0,
            grid=(num_parts, k_steps),
            in_specs=[
                pl.BlockSpec((tile_rows, _LANES), pg_map),
                pl.BlockSpec((tile_rows, _LANES), pg_map),
                pl.BlockSpec((tile_rows, _LANES), mask_map),
            ],
            out_specs=pl.BlockSpec((_SUBLANES, _LANES), lambda p, k: (p, 0)),
            scratch_shapes=[pltpu.VMEM((_SUBLANES, _LANES), jnp.float32)],
        ),
        compiler_params=pltpu.CompilerParams(
            dimension_semantics=("parallel", "arbitrary"),
        ),
        cost_estimate=cost,
    )(pred2, gt2, mask2)

    # Tiny final cross-lane reduction + mean divide in the wrapper.
    return jnp.sum(partials) / jnp.float32(total)


def criterion_forward(outputs, ray_batch, scalars_to_log):
    """Mirror of Criterion.forward: returns (loss, scalars_to_log)."""
    loss = criterion_loss(outputs["rgb"], ray_batch["rgb"], outputs["mask"])
    return loss, scalars_to_log


def _reference_loss(pred_rgb, gt_rgb, mask):
    m = mask.astype(jnp.float32)[:, None]
    p = pred_rgb.astype(jnp.float32) * m
    g = gt_rgb.astype(jnp.float32) * m
    d = jnp.abs(p - g)
    elem = jnp.where(d < 1.0, 0.5 * d * d, d - 0.5)
    return jnp.mean(elem)


if __name__ == "__main__":
    key = jax.random.PRNGKey(0)
    k1, k2, k3 = jax.random.split(key, 3)

    # Small shapes consistent with the module: N rays x 3 rgb channels + mask.
    n_rays, c = 128, 3
    pred_rgb = jax.random.uniform(k1, (n_rays, c), dtype=jnp.float32) * 2.0
    gt_rgb = jax.random.uniform(k2, (n_rays, c), dtype=jnp.float32)
    mask = jax.random.uniform(k3, (n_rays,)) > 0.3  # bool, .float() in forward

    outputs = {"rgb": pred_rgb, "mask": mask}
    ray_batch = {"rgb": gt_rgb}
    scalars_to_log = {}

    loss, scalars_to_log = criterion_forward(outputs, ray_batch, scalars_to_log)
    loss = jax.block_until_ready(loss)
    ref = _reference_loss(pred_rgb, gt_rgb, mask)
    assert jnp.allclose(loss, ref, rtol=1e-5, atol=1e-6), (loss, ref)

    # Unaligned N*3 (not a multiple of 128): minimal-pad + boundary-mask path.
    k4, k5, k6 = jax.random.split(jax.random.PRNGKey(1), 3)
    n2 = 1000
    p2 = jax.random.uniform(k4, (n2, c), dtype=jnp.float32) * 3.0
    g2 = jax.random.uniform(k5, (n2, c), dtype=jnp.float32)
    m2 = jax.random.uniform(k6, (n2,)) > 0.5
    loss2 = jax.block_until_ready(criterion_loss(p2, g2, m2))
    ref2 = _reference_loss(p2, g2, m2)
    assert jnp.allclose(loss2, ref2, rtol=1e-5, atol=1e-6), (loss2, ref2)

    # Lane-aligned N*3 (zero-copy path, no pads) with native bf16 rgb streams.
    k7, k8, k9 = jax.random.split(jax.random.PRNGKey(2), 3)
    n3 = 4096
    p3 = (jax.random.uniform(k7, (n3, c), dtype=jnp.float32) * 4.0).astype(jnp.bfloat16)
    g3 = jax.random.uniform(k8, (n3, c), dtype=jnp.float32).astype(jnp.bfloat16)
    m3 = jax.random.uniform(k9, (n3,)) > 0.5
    loss3 = jax.block_until_ready(criterion_loss(p3, g3, m3))
    ref3 = _reference_loss(p3, g3, m3)
    assert jnp.allclose(loss3, ref3, rtol=1e-4, atol=1e-5), (loss3, ref3)

    print("KERNEL_OK")
</pallas_src>

<mosaic_0001>
module attributes {stable_mosaic.version = 11 : i64} {
  func.func @_smooth_l1_kernel(%arg0: i32, %arg1: i32, %arg2: memref<32x128xf32, #tpu.memory_space<vmem>>, %arg3: memref<32x128xf32, #tpu.memory_space<vmem>>, %arg4: memref<32x128xi8, #tpu.memory_space<vmem>>, %arg5: memref<8x128xf32, #tpu.memory_space<vmem>>, %arg6: memref<8x128xf32, #tpu.memory_space<vmem>>) attributes {dimension_semantics = [#tpu.dimension_semantics<parallel>, #tpu.dimension_semantics<arbitrary>], iteration_bounds = array<i64: 1, 1>, scalar_prefetch = 0 : i64, scratch_operands = 1 : i64, tpu.core_type = #tpu.core_type<tc>, window_params = [{transform_indices = @transform_0, window_bounds = array<i64: 32, 128>}, {transform_indices = @transform_1, window_bounds = array<i64: 32, 128>}, {transform_indices = @transform_2, window_bounds = array<i64: 32, 128>}, {transform_indices = @transform_3, window_bounds = array<i64: 8, 128>}]} {
    %c0_i32 = arith.constant 0 : i32
    %0 = arith.cmpi eq, %arg1, %c0_i32 : i32
    %1 = arith.extui %0 : i1 to i32
    %c0_i32_0 = arith.constant 0 : i32
    %2 = arith.cmpi ne, %1, %c0_i32_0 : i32
    scf.if %2 {
      %cst_17 = arith.constant 0.000000e+00 : f32
      %30 = vector.broadcast %cst_17 : f32 to vector<8x128xf32>
      %c0_18 = arith.constant 0 : index
      %c0_19 = arith.constant 0 : index
      %31 = vector.load %arg6[%c0_18, %c0_19] : memref<8x128xf32, #tpu.memory_space<vmem>>, vector<8x128xf32>
      tpu.vector_store %arg6[%c0_18, %c0_19], %30 {strides = array<i32>} : memref<8x128xf32, #tpu.memory_space<vmem>>, vector<8x128xf32>,
    } else {
    }
    %c0 = arith.constant 0 : index
    %c0_1 = arith.constant 0 : index
    %3 = vector.load %arg2[%c0, %c0_1] : memref<32x128xf32, #tpu.memory_space<vmem>>, vector<32x128xf32>
    %c0_2 = arith.constant 0 : index
    %c0_3 = arith.constant 0 : index
    %4 = vector.load %arg3[%c0_2, %c0_3] : memref<32x128xf32, #tpu.memory_space<vmem>>, vector<32x128xf32>
    %c0_4 = arith.constant 0 : index
    %c0_5 = arith.constant 0 : index
    %5 = vector.load %arg4[%c0_4, %c0_5] : memref<32x128xi8, #tpu.memory_space<vmem>>, vector<32x128xi8>
    %6 = arith.sitofp %5 : vector<32x128xi8> to vector<32x128xf32>
    %7 = arith.subf %3, %4 : vector<32x128xf32>
    %8 = arith.mulf %7, %6 : vector<32x128xf32>
    %9 = math.absf %8 : vector<32x128xf32>
    %cst = arith.constant 1.000000e+00 : f32
    %10 = vector.broadcast %cst : f32 to vector<32x128xf32>
    %11 = arith.cmpf olt, %9, %10 : vector<32x128xf32>
    %cst_6 = arith.constant 5.000000e-01 : f32
    %12 = vector.broadcast %cst_6 : f32 to vector<32x128xf32>
    %13 = arith.mulf %12, %9 : vector<32x128xf32>
    %14 = arith.mulf %13, %9 : vector<32x128xf32>
    %cst_7 = arith.constant 5.000000e-01 : f32
    %15 = vector.broadcast %cst_7 : f32 to vector<32x128xf32>
    %16 = arith.subf %9, %15 : vector<32x128xf32>
    %17 = arith.select %11, %14, %16 : vector<32x128xi1>, vector<32x128xf32>
    %cst_8 = arith.constant 0.000000e+00 : f32
    %18 = vector.broadcast %cst_8 : f32 to vector<32x128xf32>
    %19 = arith.cmpf one, %6, %18 : vector<32x128xf32>
    %cst_9 = arith.constant 0.000000e+00 : f32
    %20 = vector.broadcast %cst_9 : f32 to vector<32x128xf32>
    %21 = arith.select %19, %17, %20 : vector<32x128xi1>, vector<32x128xf32>
    %c0_10 = arith.constant 0 : index
    %c0_11 = arith.constant 0 : index
    %22 = vector.load %arg6[%c0_10, %c0_11] : memref<8x128xf32, #tpu.memory_space<vmem>>, vector<8x128xf32>
    %23 = vector.shape_cast %21 : vector<32x128xf32> to vector<4x8x128xf32>
    %cst_12 = arith.constant dense<0.000000e+00> : vector<8x128xf32>
    %24 = vector.multi_reduction <add>, %23, %cst_12 [0] : vector<4x8x128xf32> to vector<8x128xf32>
    %25 = arith.addf %22, %24 : vector<8x128xf32>
    %c0_13 = arith.constant 0 : index
    %c0_14 = arith.constant 0 : index
    %26 = vector.load %arg6[%c0_13, %c0_14] : memref<8x128xf32, #tpu.memory_space<vmem>>, vector<8x128xf32>
    tpu.vector_store %arg6[%c0_13, %c0_14], %25 {strides = array<i32>} : memref<8x128xf32, #tpu.memory_space<vmem>>, vector<8x128xf32>,
    %c0_i32_15 = arith.constant 0 : i32
    %27 = arith.cmpi eq, %arg1, %c0_i32_15 : i32
    %28 = arith.extui %27 : i1 to i32
    %c0_i32_16 = arith.constant 0 : i32
    %29 = arith.cmpi ne, %28, %c0_i32_16 : i32
    scf.if %29 {
      %c0_17 = arith.constant 0 : index
      %c0_18 = arith.constant 0 : index
      %30 = vector.load %arg6[%c0_17, %c0_18] : memref<8x128xf32, #tpu.memory_space<vmem>>, vector<8x128xf32>
      %c0_19 = arith.constant 0 : index
      %c0_20 = arith.constant 0 : index
      %31 = vector.load %arg5[%c0_19, %c0_20] : memref<8x128xf32, #tpu.memory_space<vmem>>, vector<8x128xf32>
      tpu.vector_store %arg5[%c0_19, %c0_20], %30 {strides = array<i32>} : memref<8x128xf32, #tpu.memory_space<vmem>>, vector<8x128xf32>,
    } else {
    }
    return
  }
  func.func @transform_0(%arg0: i32, %arg1: i32) -> (i32, i32) {
    %c1_i32 = arith.constant 1 : i32
    %0 = arith.muli %arg0, %c1_i32 : i32
    %1 = arith.addi %0, %arg1 : i32
    %c0_i32 = arith.constant 0 : i32
    %2 = arith.minsi %1, %c0_i32 : i32
    %c0_i32_0 = arith.constant 0 : i32
    %c0_i32_1 = arith.constant 0 : i32
    return %2, %c0_i32_0 : i32, i32
  }
  func.func @transform_1(%arg0: i32, %arg1: i32) -> (i32, i32) {
    %c1_i32 = arith.constant 1 : i32
    %0 = arith.muli %arg0, %c1_i32 : i32
    %1 = arith.addi %0, %arg1 : i32
    %c0_i32 = arith.constant 0 : i32
    %2 = arith.minsi %1, %c0_i32 : i32
    %c0_i32_0 = arith.constant 0 : i32
    %c0_i32_1 = arith.constant 0 : i32
    return %2, %c0_i32_0 : i32, i32
  }
  func.func @transform_2(%arg0: i32, %arg1: i32) -> (i32, i32) {
    %c1_i32 = arith.constant 1 : i32
    %0 = arith.muli %arg0, %c1_i32 : i32
    %1 = arith.addi %0, %arg1 : i32
    %c0_i32 = arith.constant 0 : i32
    %c0_i32_0 = arith.constant 0 : i32
    return %1, %c0_i32 : i32, i32
  }
  func.func @transform_3(%arg0: i32, %arg1: i32) -> (i32, i32) {
    %c0_i32 = arith.constant 0 : i32
    %c0_i32_0 = arith.constant 0 : i32
    return %arg0, %c0_i32 : i32, i32
  }
}

</mosaic_0001>

<bundles_post_ra>
// kernel: tpu_custom_call.1
= control target key start
LH: loop header
LB: loop body
LE: loop exit
PB: predicated region body
PF: predicated region fallthrough
CT: control target
= control target key end

     0   :  { %8 = vsyncpa [#allocation4], 0  ;;  %s363_s0 = inlined_call_operand.hbm [shape: f32[32,128], index: 0, kind: input, shape index: {}]   ;;  %s364_s1 = inlined_call_operand.hbm [shape: f32[32,128], index: 1, kind: input, shape index: {}]   ;;  %s365_s2 = inlined_call_operand.hbm [shape: s8[32,128], index: 2, kind: input, shape index: {}]   ;;  %s366_s3 = inlined_call_operand.hbm [shape: f32[8,128], index: 3, kind: output, shape index: {}]  }
   0x1   :  { %9 = vsyncpa [#allocation7], 0 }
   0x2   :  { %10 = vsyncpa [#allocation5], 0  ;;  %s275_s12 = smov [#allocation6]   ;;  %s276_s14 = smov [#allocation3]  }
   0x3   :  { %s40_s13 = sshll.u32 %s275_s12, 4  ;;  %s22_s15 = sshll.u32 %s276_s14, 4  ;;  %s41_s13 = int_to_ptr.vmem [resolvable:$true] %s40_s13  ;;  %s301_s15 = int_to_ptr.vmem [resolvable:$true] %s22_s15 }
   0x4   :  { %s181_s18 = scalar_lea.hbm %s364_s1, 512 }
   0x5   :  { %p182_p0 = scmp.ne.s32.totalorder %s364_s1, %s181_s18  ;;  %p185_p1 = scmp.lt.u32.totalorder %s181_s18, %s364_s1 }
   0x7   :  { %p187_p2 = pnand %p185_p1, %p182_p0 }
   0x9   :  { %190 = shalt.err (!%p187_p2)
}
   0xa   :  { %s191_s23 = scalar_lea.vmem %s41_s13, 512  ;;  %p196_p4 = scmp.lt.s32.totalorder %s41_s13, %s41_s13 }
   0xb   :  { %p192_p3 = scmp.ne.s32.totalorder %s41_s13, %s191_s23  ;;  %p197_p5 = scmp.lt.s32.totalorder %s191_s23, %s191_s23 }
   0xd   :  { %p198_p6 = por %p197_p5, %p196_p4 }
   0xf   :  { %p199_p7 = pnand %p198_p6, %p192_p3 }
  0x11   :  { %202 = shalt.err (!%p199_p7)
}
  0x12   :  { %s277_s24 = smov 128   ;;  %s278_s25 = smov 8  }
  0x13   :  { %46 = dma.hbm_to_vmem [thread:$0]  %s364_s1, 512, %s41_s13, [#allocation7], %s277_s24, %s277_s24, %s278_s25  }
  0x14   :  { %s203_s30 = scalar_lea.hbm %s363_s0, 512 }
  0x15   :  { %p204_p8 = scmp.ne.s32.totalorder %s363_s0, %s203_s30  ;;  %p207_p9 = scmp.lt.u32.totalorder %s203_s30, %s363_s0 }
  0x17   :  { %p209_p10 = pnand %p207_p9, %p204_p8 }
  0x19   :  { %212 = shalt.err (!%p209_p10)
}
  0x1a   :  { %s213_s8 = scalar_lea.vmem %s301_s15, 512  ;;  %p218_p12 = scmp.lt.s32.totalorder %s301_s15, %s301_s15 }
  0x1b   :  { %p214_p11 = scmp.ne.s32.totalorder %s301_s15, %s213_s8  ;;  %p219_p13 = scmp.lt.s32.totalorder %s213_s8, %s213_s8 }
  0x1d   :  { %p220_p0 = por %p219_p13, %p218_p12 }
  0x1f   :  { %p221_p1 = pnand %p220_p0, %p214_p11 }
  0x21   :  { %224 = shalt.err (!%p221_p1)
}
  0x22   :  { %28 = dma.hbm_to_vmem [thread:$0]  %s363_s0, 512, %s301_s15, [#allocation4], %s277_s24, %s277_s24, %s278_s25  }
  0x23   :  { %s279_s10 = smov [#allocation8]   ;;  %s225_s14 = scalar_lea.hbm %s365_s2, 128 }
  0x24   :  { %s56_s11 = sshll.u32 %s279_s10, 4  ;;  %p226_p2 = scmp.ne.s32.totalorder %s365_s2, %s225_s14  ;;  %s57_s11 = int_to_ptr.vmem [resolvable:$true] %s56_s11 }
  0x25   :  { %p229_p3 = scmp.lt.u32.totalorder %s225_s14, %s365_s2 }
  0x27   :  { %p231_p4 = pnand %p229_p3, %p226_p2 }
  0x29   :  { %234 = shalt.err (!%p231_p4)
}
  0x2a   :  { %s235_s20 = scalar_lea.vmem %s57_s11, 128  ;;  %p240_p6 = scmp.lt.s32.totalorder %s57_s11, %s57_s11 }
  0x2b   :  { %p236_p5 = scmp.ne.s32.totalorder %s57_s11, %s235_s20  ;;  %p241_p7 = scmp.lt.s32.totalorder %s235_s20, %s235_s20 }
  0x2d   :  { %p242_p8 = por %p241_p7, %p240_p6 }
  0x2f   :  { %p243_p9 = pnand %p242_p8, %p236_p5 }
  0x31   :  { %246 = shalt.err (!%p243_p9)
}
  0x32   :  { %59 = dma.hbm_to_vmem [thread:$0]  %s365_s2, 128, %s57_s11, [#allocation7]  }
  0x33   :  { %269 = dma.done.wait [#allocation4], 512  }
  0x34   :  { %270 = vsyncadd [#allocation4], 4294966784 }
  0x35   :  { %271 = dma.done.wait [#allocation7], 640  }
  0x36   :  { %272 = vsyncadd [#allocation7], 4294966656  ;;  %v83_v0 = vld [vmem:[#allocation3] sm:$0xff]  ;;  %v84_v1 = vld [vmem:[#allocation3 + $0x8] sm:$0xff]  ;;  %s280_s2 = smov [#allocation9]  }
  0x37   :  { %v85_v2 = vld [vmem:[#allocation3 + $0x10] sm:$0xff]  ;;  %v86_v3 = vld [vmem:[#allocation3 + $0x18] sm:$0xff]  ;;  %v87_v4 = vld [vmem:[#allocation6] sm:$0xff]  ;;  %s157_s21 = sshll.u32 %s280_s2, 4  ;;  %s158_s21 = int_to_ptr.vmem [resolvable:$true] %s157_s21 }
  0x38   :  { %v88_v5 = vld [vmem:[#allocation6 + $0x8] sm:$0xff]  ;;  %v89_v6 = vld [vmem:[#allocation6 + $0x10] sm:$0xff]  ;;  %v90_v7 = vld [vmem:[#allocation6 + $0x18] sm:$0xff]  ;;  %v100_v9 = vsub.f32 %v83_v0, %v87_v4  ;;  %s247_s22 = scalar_lea.vmem %s158_s21, 128  ;;  %p252_p11 = scmp.lt.s32.totalorder %s158_s21, %s158_s21 }
  0x39   :  { %v91_v8 = vld [vmem:[#allocation8] sm:$0xff]  ;;  %v101_v10 = vsub.f32 %v84_v1, %v88_v5  ;;  %v102_v15 = vsub.f32 %v85_v2, %v89_v6  ;;  %v103_v16 = vsub.f32 %v86_v3, %v90_v7  ;;  %p248_p10 = scmp.ne.s32.totalorder %s158_s21, %s247_s22  ;;  %p253_p12 = scmp.lt.s32.totalorder %s247_s22, %s247_s22 }
  0x3a   :  { %v92_v11 = vunpack.c.0.s8 %v91_v8  ;;  %v93_v12 = vunpack.c.1.s8 %v91_v8  ;;  %v94_v13 = vunpack.c.2.s8 %v91_v8  ;;  %v95_v14 = vunpack.c.3.s8 %v91_v8 }
  0x3b   :  { %p254_p13 = por %p253_p12, %p252_p11 }
  0x3c   :  { %v96_v17 = vcvt.s32.f32 %v92_v11  ;;  %v97_v18 = vcvt.s32.f32 %v93_v12  ;;  %v98_v19 = vcvt.s32.f32 %v94_v13  ;;  %v99_v20 = vcvt.s32.f32 %v95_v14 }
  0x3d   :  { %p255_p0 = pnand %p254_p13, %p248_p10 }
  0x3e   :  { %v104_v21 = vmul.f32 %v100_v9, %v96_v17  ;;  %v105_v22 = vmul.f32 %v101_v10, %v97_v18  ;;  %v106_v23 = vmul.f32 %v102_v15, %v98_v19  ;;  %v107_v24 = vmul.f32 %v103_v16, %v99_v20 }
  0x3f   :  { %vm132_vm0 = vcmp.ne.f32.partialorder %v96_v17, 0.0  ;;  %vm133_vm1 = vcmp.ne.f32.partialorder %v97_v18, 0.0  ;;  %vm134_vm2 = vcmp.ne.f32.partialorder %v98_v19, 0.0  ;;  %vm135_vm7 = vcmp.ne.f32.partialorder %v99_v20, 0.0 }
  0x40   :  { %v108_v25 = vand.u32 2147483647, %v104_v21  ;;  %v109_v26 = vand.u32 2147483647, %v105_v22  ;;  %v110_v27 = vand.u32 2147483647, %v106_v23 }
  0x41   :  { %v111_v28 = vand.u32 2147483647, %v107_v24 }
  0x42   :  { %vm112_vm3 = vcmp.lt.f32.partialorder %v108_v25, 1.0  ;;  %vm113_vm4 = vcmp.lt.f32.partialorder %v109_v26, 1.0  ;;  %vm114_vm5 = vcmp.lt.f32.partialorder %v110_v27, 1.0  ;;  %v116_v29 = vmul.f32 0.5, %v108_v25 }
  0x43   :  { %vm115_vm6 = vcmp.lt.f32.partialorder %v111_v28, 1.0  ;;  %v117_v30 = vmul.f32 0.5, %v109_v26  ;;  %v118_v31 = vmul.f32 0.5, %v110_v27  ;;  %v119_v32 = vmul.f32 0.5, %v111_v28 }
  0x44   :  { %v120_v33 = vmul.f32 %v116_v29, %v108_v25  ;;  %v171_v34 = vadd.f32 -0.5, %v108_v25  ;;  %v172_v35 = vadd.f32 -0.5, %v109_v26  ;;  %v173_v36 = vadd.f32 -0.5, %v110_v27 }
  0x45   :  { %v121_v37 = vmul.f32 %v117_v30, %v109_v26  ;;  %v122_v38 = vmul.f32 %v118_v31, %v110_v27  ;;  %v123_v39 = vmul.f32 %v119_v32, %v111_v28  ;;  %v174_v40 = vadd.f32 -0.5, %v111_v28 }
  0x46   :  { %v128_v41 = vsel %vm112_vm3, %v120_v33, %v171_v34 }
  0x47   :  { %v129_v42 = vsel %vm113_vm4, %v121_v37, %v172_v35  ;;  %v130_v43 = vsel %vm114_vm5, %v122_v38, %v173_v36  ;;  %v131_v44 = vsel %vm115_vm6, %v123_v39, %v174_v40  ;;  %v136_v45 = vsel %vm132_vm0, %v128_v41, 0.0 }
  0x48   :  { %v137_v46 = vsel %vm133_vm1, %v129_v42, 0.0  ;;  %v138_v47 = vsel %vm134_vm2, %v130_v43, 0.0  ;;  %v139_v49 = vsel %vm135_vm7, %v131_v44, 0.0 }
  0x49   :  { %v141_v48 = vadd.f32 %v137_v46, %v136_v45 }
  0x4b   :  { %v142_v50 = vadd.f32 %v141_v48, %v138_v47 }
  0x4d   :  { %v143_v51 = vadd.f32 %v142_v50, %v139_v49 }
  0x4f   :  { %150 = vst [vmem:[#allocation9] sm:$0xff] %v143_v51 }
  0x50   :  { %258 = shalt.err (!%p255_p0)
}
  0x51   :  { %s259_s25 = scalar_lea.hbm %s366_s3, 128 }
  0x52   :  { %p260_p1 = scmp.ne.s32.totalorder %s366_s3, %s259_s25  ;;  %p263_p2 = scmp.lt.u32.totalorder %s259_s25, %s366_s3 }
  0x54   :  { %p265_p3 = pnand %p263_p2, %p260_p1 }
  0x56   :  { %268 = shalt.err (!%p265_p3)
}
  0x57   :  { %160 = dma.vmem_to_hbm [thread:$0]  %s158_s21, 128, %s366_s3, [#allocation5]  }
  0x58   :  { %273 = dma.done.wait [#allocation5], 128  }
  0x59   :  { %274 = vsyncadd [#allocation5], 4294967168 }
  0x5a   :  { %164 = vsyncpa [#allocation4], 1 }
  0x5b   :  { %165 = vsyncpa [#allocation7], 1 }
  0x5c   :  { %166 = vsyncpa [#allocation5], 1 }

</bundles_post_ra>
